<compile_context>
chip_gen: v6e
topology: v6e:2x2x1
jax: 0.10.0
libtpu: 0.0.40
codegen_flags: <defaults>
</compile_context>

<pallas_src>
import math

import jax
import jax.numpy as jnp
from jax.experimental import pallas as pl
from jax.experimental.pallas import tpu as pltpu


def make_positional_encoding(d_model: int, max_len: int = 5000,
                             dtype=jnp.float32) -> jnp.ndarray:
    """Deterministic sinusoidal PE buffer, same as the PyTorch __init__."""
    assert d_model % 2 == 0, "d_model must be even (same assumption as the PyTorch module)"
    position = jnp.arange(0, max_len, dtype=jnp.float32)[:, None]            # [max_len, 1]
    div_term = jnp.exp(
        jnp.arange(0, d_model, 2, dtype=jnp.float32) * (-math.log(10000.0) / d_model)
    )                                                                         # [d_model/2]
    pe = jnp.zeros((max_len, d_model), dtype=jnp.float32)
    pe = pe.at[:, 0::2].set(jnp.sin(position * div_term))
    pe = pe.at[:, 1::2].set(jnp.cos(position * div_term))
    return pe.astype(dtype)                                                   # [max_len, d_model]


# ----------------------------------------------------------------------------
# Kernels
# ----------------------------------------------------------------------------

def _pe_add_kernel(x_ref, pe_ref, o_ref):
    # x_ref / o_ref: (TS, D) (batch dim squeezed); pe_ref: (TS, D).
    o_ref[...] = (x_ref[...] + pe_ref[...]).astype(o_ref.dtype)


def _pe_add_flat_kernel(x_ref, pe_ref, o_ref):
    # x_ref / o_ref: (B, TF) lane-dense flattened tiles; pe_ref: (1, TF) broadcast.
    o_ref[...] = (x_ref[...] + pe_ref[...]).astype(o_ref.dtype)


# ----------------------------------------------------------------------------
# Wrappers
# ----------------------------------------------------------------------------

_BLOCK_BYTES = 2 * 1024 * 1024  # ~2 MiB per x-tile -> ~12 MiB live with 2-deep buffering


def _forward_tiled(x: jnp.ndarray, pe: jnp.ndarray) -> jnp.ndarray:
    """Main path: 3-D x, sequence axis tiled, lane axis = D (multiple of 128)."""
    B, S, D = x.shape
    itemsize = jnp.dtype(x.dtype).itemsize
    sub = max(8, 32 // itemsize)  # sublane packing: 8 for f32, 16 for bf16

    rows = max(_BLOCK_BYTES // max(D * itemsize, 1), sub)
    ts = min(S, 512, rows)
    if ts < S:
        ts = max((ts // sub) * sub, sub)  # partial-tile blocks must be sublane-aligned

    grid = (B, pl.cdiv(S, ts))
    return pl.pallas_call(
        _pe_add_kernel,
        out_shape=jax.ShapeDtypeStruct((B, S, D), x.dtype),
        grid_spec=pltpu.PrefetchScalarGridSpec(
            num_scalar_prefetch=0,
            grid=grid,
            in_specs=[
                # batch dim squeezed -> kernel sees (ts, D)
                pl.BlockSpec((None, ts, D), lambda b, s: (b, s, 0)),
                # index straight into the full [max_len, D] pe buffer (no pe[:S] copy)
                pl.BlockSpec((ts, D), lambda b, s: (s, 0)),
            ],
            out_specs=pl.BlockSpec((None, ts, D), lambda b, s: (b, s, 0)),
        ),
        compiler_params=pltpu.CompilerParams(
            dimension_semantics=("parallel", "parallel"),
        ),
        cost_estimate=pl.CostEstimate(
            flops=B * S * D,
            transcendentals=0,
            bytes_accessed=(2 * B * S * D + S * D) * itemsize,
        ),
    )(x, pe)


def _forward_flat(x: jnp.ndarray, pe: jnp.ndarray) -> jnp.ndarray:
    """Lane-dense path for D not a multiple of 128: flatten (S, D) -> S*D."""
    B, S, D = x.shape
    itemsize = jnp.dtype(x.dtype).itemsize
    F = S * D

    x_flat = x.reshape(B, F)
    pe_flat = pe.reshape(1, -1)  # (1, max_len*D); element s*D+d == pe[s, d]

    tf = min(F, max(128, (_BLOCK_BYTES // (B * itemsize)) // 128 * 128))
    grid = (pl.cdiv(F, tf),)

    out = pl.pallas_call(
        _pe_add_flat_kernel,
        out_shape=jax.ShapeDtypeStruct((B, F), x.dtype),
        grid_spec=pltpu.PrefetchScalarGridSpec(
            num_scalar_prefetch=0,
            grid=grid,
            in_specs=[
                pl.BlockSpec((B, tf), lambda s: (0, s)),
                pl.BlockSpec((1, tf), lambda s: (0, s)),
            ],
            out_specs=pl.BlockSpec((B, tf), lambda s: (0, s)),
        ),
        compiler_params=pltpu.CompilerParams(
            dimension_semantics=("parallel",),
        ),
        cost_estimate=pl.CostEstimate(
            flops=B * F,
            transcendentals=0,
            bytes_accessed=(2 * B * F + F) * itemsize,
        ),
    )(x_flat, pe_flat)
    return out.reshape(B, S, D)


def positional_encoding_forward(x: jnp.ndarray, pe: jnp.ndarray) -> jnp.ndarray:
    """x: [B, S, D]; pe: [max_len, D]. Returns x + pe[:S] broadcast over batch."""
    B, S, D = x.shape
    assert S <= pe.shape[0], "sequence longer than max_len"
    assert D == pe.shape[1], "hidden dim mismatch with pe buffer"

    if D % 128 != 0 and (S * D) % 128 == 0:
        # D narrower than a lane row: present a lane-dense flattened layout instead
        # of paying masked partial stores on every tile.
        return _forward_flat(x, pe)
    return _forward_tiled(x, pe)

    # TODO(synk): for production, prefer fusing this elementwise add into the adjacent
    # embedding / projection kernel; a standalone bandwidth-bound add only pays launch
    # and pipeline-ramp overhead on top of the HBM roofline.


if __name__ == "__main__":
    max_len = 5000  # matches PyTorch default
    key = jax.random.PRNGKey(0)

    # Case 1 (module-implied small shapes, D < 128 -> lane-dense flattened path)
    B, S, D = 2, 8, 32
    k1, k2 = jax.random.split(key)
    x1 = jax.random.normal(k1, (B, S, D), dtype=jnp.float32)
    pe1 = make_positional_encoding(D, max_len)
    out1 = jax.block_until_ready(positional_encoding_forward(x1, pe1))
    ref1 = x1 + pe1[None, :S, :]
    assert out1.shape == (B, S, D)
    assert jnp.allclose(out1, ref1, atol=1e-6), "flat-path mismatch vs reference"

    # Case 2 (D multiple of 128 -> tiled 3-D path with squeezed batch dim)
    B2, S2, D2 = 2, 16, 128
    x2 = jax.random.normal(k2, (B2, S2, D2), dtype=jnp.float32)
    pe2 = make_positional_encoding(D2, max_len)
    out2 = jax.block_until_ready(positional_encoding_forward(x2, pe2))
    ref2 = x2 + pe2[None, :S2, :]
    assert out2.shape == (B2, S2, D2)
    assert jnp.allclose(out2, ref2, atol=1e-6), "tiled-path mismatch vs reference"

    print("KERNEL_OK")
</pallas_src>

<mosaic_0001>
module attributes {stable_mosaic.version = 11 : i64} {
  func.func @_pe_add_flat_kernel(%arg0: i32, %arg1: memref<2x256xf32, #tpu.memory_space<vmem>>, %arg2: memref<1x256xf32, #tpu.memory_space<vmem>>, %arg3: memref<2x256xf32, #tpu.memory_space<vmem>>) attributes {dimension_semantics = [#tpu.dimension_semantics<parallel>], iteration_bounds = array<i64: 1>, scalar_prefetch = 0 : i64, scratch_operands = 0 : i64, tpu.core_type = #tpu.core_type<tc>, window_params = [{transform_indices = @transform_0, window_bounds = array<i64: 2, 256>}, {transform_indices = @transform_1, window_bounds = array<i64: 1, 256>}, {transform_indices = @transform_2, window_bounds = array<i64: 2, 256>}]} {
    %c0 = arith.constant 0 : index
    %c0_0 = arith.constant 0 : index
    %0 = vector.load %arg1[%c0, %c0_0] : memref<2x256xf32, #tpu.memory_space<vmem>>, vector<2x256xf32>
    %c0_1 = arith.constant 0 : index
    %c0_2 = arith.constant 0 : index
    %1 = vector.load %arg2[%c0_1, %c0_2] : memref<1x256xf32, #tpu.memory_space<vmem>>, vector<1x256xf32>
    %2 = vector.broadcast %1 : vector<1x256xf32> to vector<2x256xf32>
    %3 = arith.addf %0, %2 : vector<2x256xf32>
    %c0_3 = arith.constant 0 : index
    %c0_4 = arith.constant 0 : index
    %4 = vector.load %arg3[%c0_3, %c0_4] : memref<2x256xf32, #tpu.memory_space<vmem>>, vector<2x256xf32>
    tpu.vector_store %arg3[%c0_3, %c0_4], %3 {strides = array<i32>} : memref<2x256xf32, #tpu.memory_space<vmem>>, vector<2x256xf32>,
    return
  }
  func.func @transform_0(%arg0: i32) -> (i32, i32) {
    %c0_i32 = arith.constant 0 : i32
    %c0_i32_0 = arith.constant 0 : i32
    return %c0_i32, %arg0 : i32, i32
  }
  func.func @transform_1(%arg0: i32) -> (i32, i32) {
    %c0_i32 = arith.constant 0 : i32
    %c0_i32_0 = arith.constant 0 : i32
    return %c0_i32, %arg0 : i32, i32
  }
  func.func @transform_2(%arg0: i32) -> (i32, i32) {
    %c0_i32 = arith.constant 0 : i32
    %c0_i32_0 = arith.constant 0 : i32
    return %c0_i32, %arg0 : i32, i32
  }
}

</mosaic_0001>

<bundles_post_ra>
// kernel: tpu_custom_call.1
= control target key start
LH: loop header
LB: loop body
LE: loop exit
PB: predicated region body
PF: predicated region fallthrough
CT: control target
= control target key end

     0   :  { %7 = vsyncpa [#allocation3], 0  ;;  %s172_s0 = inlined_call_operand.hbm [shape: f32[2,256], index: 0, kind: input, shape index: {}]   ;;  %s173_s1 = inlined_call_operand.hbm [shape: f32[1,160000], index: 1, kind: input, shape index: {}]   ;;  %s174_s2 = inlined_call_operand.hbm [shape: f32[2,256], index: 2, kind: output, shape index: {}]  }
   0x1   :  { %8 = vsyncpa [#allocation6], 0 }
   0x2   :  { %9 = vsyncpa [#allocation4], 0  ;;  %s144_s9 = smov [#allocation2]   ;;  %s145_s11 = smov [#allocation5]  }
   0x3   :  { %s16_s10 = sshll.u32 %s144_s9, 4  ;;  %s26_s12 = sshll.u32 %s145_s11, 4  ;;  %s17_s10 = int_to_ptr.vmem [resolvable:$true] %s16_s10  ;;  %s27_s12 = int_to_ptr.vmem [resolvable:$true] %s26_s12 }
   0x4   :  { %s86_s13 = scalar_lea.vmem %s17_s10, 64  ;;  %p91_p1 = scmp.lt.s32.totalorder %s17_s10, %s17_s10 }
   0x5   :  { %p87_p0 = scmp.ne.s32.totalorder %s17_s10, %s86_s13  ;;  %p92_p2 = scmp.lt.s32.totalorder %s86_s13, %s86_s13 }
   0x7   :  { %p93_p3 = por %p92_p2, %p91_p1 }
   0x9   :  { %p94_p4 = pnand %p93_p3, %p87_p0 }
   0xb   :  { %97 = shalt.err (!%p94_p4)
}
   0xc   :  { %19 = dma.hbm_to_vmem [thread:$0]  %s172_s0, 64, %s17_s10, [#allocation3]  }
   0xd   :  { %s106_s16 = scalar_lea.vmem %s27_s12, 32  ;;  %p111_p6 = scmp.lt.s32.totalorder %s27_s12, %s27_s12 }
   0xe   :  { %p107_p5 = scmp.ne.s32.totalorder %s27_s12, %s106_s16  ;;  %p112_p7 = scmp.lt.s32.totalorder %s106_s16, %s106_s16 }
  0x10   :  { %p113_p8 = por %p112_p7, %p111_p6 }
  0x12   :  { %p114_p9 = pnand %p113_p8, %p107_p5 }
  0x14   :  { %117 = shalt.err (!%p114_p9)
}
  0x15   :  { %29 = dma.hbm_to_vmem [thread:$0]  %s173_s1, 32, %s27_s12, [#allocation6]  }
  0x16   :  { %138 = dma.done.wait [#allocation3], 64  }
  0x17   :  { %139 = vsyncadd [#allocation3], 4294967232 }
  0x18   :  { %140 = dma.done.wait [#allocation6], 32  }
  0x19   :  { %141 = vsyncadd [#allocation6], 4294967264  ;;  %v39_v0 = vlaneseq  ;;  %v146_v1 = vmov 1983009808   ;;  %v37_v7 = vld [vmem:[#allocation5] sm:$0x3] }
  0x1a   :  { %v49_v2 = vunpack.c.l.s4 %v146_v1  ;;  %v36_v12 = vld [vmem:[#allocation2] sm:$0xf]  ;;  %s147_s0 = smov [#allocation7]  }
  0x1b   :  { %v40_v3 = vshrl.u32 %v39_v0, 7  ;;  %s64_s19 = sshll.u32 %s147_s0, 4  ;;  %s65_s19 = int_to_ptr.vmem [resolvable:$true] %s64_s19 }
  0x1c   :  { %v50_v6 = vunpack.c.0.s8 %v49_v2  ;;  %s118_s1 = scalar_lea.vmem %s65_s19, 64  ;;  %p123_p11 = scmp.lt.s32.totalorder %s65_s19, %s65_s19 }
  0x1d   :  { %v41_v4 = vsub.s32 0, %v40_v3  ;;  %v45_v5 = vsub.s32 1, %v40_v3  ;;  %p119_p10 = scmp.ne.s32.totalorder %s65_s19, %s118_s1  ;;  %p124_p12 = scmp.lt.s32.totalorder %s118_s1, %s118_s1 }
  0x1e   :  { %v53_v10 = vsub.s32 %v50_v6, %v40_v3 }
  0x1f   :  { %v42_v8 = vrot.slane %v37_v7, %v41_v4  ;;  %v46_v9 = vrot.slane %v37_v7, %v45_v5  ;;  %p125_p13 = por %p124_p12, %p123_p11 }
  0x21   :  { %v47_v11 = vcombine.low %v42_v8, %v46_v9  ;;  %p126_p0 = pnand %p125_p13, %p119_p10 }
  0x23   :  { %v54_v13 = vrot.slane %v47_v11, %v53_v10 }
  0x25   :  { %v56_v14 = vadd.f32 %v54_v13, %v36_v12 }
  0x27   :  { %57 = vst [vmem:[#allocation7] sm:$0xf] %v56_v14 }
  0x28   :  { %129 = shalt.err (!%p126_p0)
}
  0x29   :  { %67 = dma.vmem_to_hbm [thread:$0]  %s65_s19, 64, %s174_s2, [#allocation4]  }
  0x2a   :  { %142 = dma.done.wait [#allocation4], 64  }
  0x2b   :  { %143 = vsyncadd [#allocation4], 4294967232 }
  0x2c   :  { %71 = vsyncpa [#allocation3], 1 }
  0x2d   :  { %72 = vsyncpa [#allocation6], 1 }
  0x2e   :  { %73 = vsyncpa [#allocation4], 1 }

</bundles_post_ra>
